<compile_context>
chip_gen: v7x
topology: tpu7x:2x2x1
jax: 0.10.0
libtpu: 0.0.40
codegen_flags: <defaults>
</compile_context>

<pallas_src>
import functools

import jax
import jax.numpy as jnp
from jax.experimental import pallas as pl
from jax.experimental.pallas import tpu as pltpu

C_IN_SE = 12    # input channels of conv2d40 (squeeze vector)
C_MID = 288     # out channels of conv2d40 == in channels of conv2d41
C_OUT = 48      # out channels of conv2d41


def _se_kernel(xse_ref, w1t_ref, b1_ref, w2_ref, x_ref, o_ref):
    # SE gate: s = sigmoid(x_se @ W1^T + b1) -> (1, C_MID), computed in f32.
    s = jax.nn.sigmoid(
        jnp.dot(
            xse_ref[...].astype(jnp.float32),
            w1t_ref[...].astype(jnp.float32),
            preferred_element_type=jnp.float32,
        )
        + b1_ref[...].astype(jnp.float32)
    )
    # Fold the gate into the second conv's weights (per-channel scale of the
    # contraction axis), cast only the matmul operand to the activation dtype.
    w2s = (w2_ref[...].astype(jnp.float32) * s).astype(x_ref.dtype)
    # Lane-dense channels-major matmul: (C_OUT, tile) = W2' @ x-tile.
    o_ref[...] = jnp.dot(
        w2s, x_ref[...], preferred_element_type=jnp.float32
    ).astype(o_ref.dtype)


def _pick_tiling(rows, tn_target):
    """Column tile size and grid length for the lane (spatial) dimension."""
    if rows < 256:
        # Tiny problem: one block covering the full extent (block == full array
        # dim, so no 128-divisibility requirement).
        return rows, 1
    lane_blocks = pl.cdiv(rows, 128)
    # At least 2 grid steps so v7x's two TensorCores both get work; otherwise
    # as few, as-large-as-possible tiles (per-step overhead ~0.35 us).
    n_steps = max(2, pl.cdiv(lane_blocks * 128, tn_target))
    tile = pl.cdiv(lane_blocks, n_steps) * 128
    return tile, pl.cdiv(rows, tile)


@functools.partial(jax.jit, static_argnames=("tn",))
def se_block(x121, x124, w1_oi, b1, w2_oi, *, tn=2048):
    """x121: (1, C_MID, H, W) NCHW, x124: (1, C_IN_SE, 1, 1) NCHW.

    Returns (1, C_OUT, H, W) NCHW in x121's dtype, matching the PyTorch module.
    """
    n, c_mid, h, w_sp = x121.shape
    assert c_mid == C_MID
    # TODO(synk): N>1 would need a per-batch gate (extra batch grid axis); the
    # module spec has N == 1.
    assert n == 1

    rows = n * h * w_sp
    # NCHW with n == 1 is already channels-major: pure metadata reshape, no
    # copy and NO dtype cast (kernel consumes the activation dtype directly).
    x_cm = x121.reshape(C_MID, rows)

    x_se = x124.reshape(1, C_IN_SE)
    w1t = w1_oi.reshape(C_MID, C_IN_SE).T        # (C_IN_SE, C_MID), 13 KB one-time
    b1_row = b1.reshape(1, C_MID)
    w2 = w2_oi.reshape(C_OUT, C_MID)

    tile, grid = _pick_tiling(rows, tn)

    x_item = jnp.dtype(x121.dtype).itemsize
    w_item = jnp.dtype(w2.dtype).itemsize

    out_cm = pl.pallas_call(
        _se_kernel,
        out_shape=jax.ShapeDtypeStruct((C_OUT, rows), x121.dtype),
        grid_spec=pltpu.PrefetchScalarGridSpec(
            num_scalar_prefetch=0,
            grid=(grid,),
            in_specs=[
                pl.BlockSpec((1, C_IN_SE), lambda i: (0, 0)),       # x_se   (invariant)
                pl.BlockSpec((C_IN_SE, C_MID), lambda i: (0, 0)),   # W1^T   (invariant)
                pl.BlockSpec((1, C_MID), lambda i: (0, 0)),         # b1     (invariant)
                pl.BlockSpec((C_OUT, C_MID), lambda i: (0, 0)),     # W2     (invariant)
                pl.BlockSpec((C_MID, tile), lambda i: (0, i)),      # activation tile
            ],
            out_specs=pl.BlockSpec((C_OUT, tile), lambda i: (0, i)),  # lane-dense out
        ),
        compiler_params=pltpu.CompilerParams(
            dimension_semantics=("parallel",),
        ),
        cost_estimate=pl.CostEstimate(
            flops=2 * rows * C_MID * C_OUT,
            transcendentals=grid * C_MID,
            bytes_accessed=(
                rows * C_MID * x_item
                + (C_OUT * C_MID + C_IN_SE * C_MID + C_MID + C_IN_SE) * w_item
                + rows * C_OUT * x_item
            ),
        ),
    )(x_se, w1t, b1_row, w2, x_cm)

    # (C_OUT, rows) with n == 1 reshapes straight back to NCHW (no transpose).
    return out_cm.reshape(n, C_OUT, h, w_sp)


def _reference(x121, x124, w1_oi, b1, w2_oi):
    # Pure-JAX reference of the PyTorch forward (1x1 convs as einsums).
    x125 = jnp.einsum(
        "oc,nchw->nohw", w1_oi.reshape(C_MID, C_IN_SE), x124
    ) + b1.reshape(1, C_MID, 1, 1)
    x126 = jax.nn.sigmoid(x125)
    x127 = x126 * x121
    x128 = jnp.einsum("oc,nchw->nohw", w2_oi.reshape(C_OUT, C_MID), x127)
    return x128


if __name__ == "__main__":
    key = jax.random.PRNGKey(0)
    k1, k2, k3, k4, k5 = jax.random.split(key, 5)

    w1_oi = jax.random.normal(k3, (C_MID, C_IN_SE, 1, 1), dtype=jnp.float32) * 0.1
    b1 = jax.random.normal(k4, (C_MID,), dtype=jnp.float32) * 0.1
    w2_oi = jax.random.normal(k5, (C_OUT, C_MID, 1, 1), dtype=jnp.float32) * 0.1

    # Small case (spatial 16 -> rows = 256, two exact 128-column tiles).
    x121_a = jax.random.normal(k1, (1, C_MID, 16, 16), dtype=jnp.float32)
    x124_a = jax.random.normal(k2, (1, C_IN_SE, 1, 1), dtype=jnp.float32)
    out_a = jax.block_until_ready(se_block(x121_a, x124_a, w1_oi, b1, w2_oi))
    ref_a = _reference(x121_a, x124_a, w1_oi, b1, w2_oi)
    assert out_a.shape == (1, C_OUT, 16, 16), out_a.shape
    assert jnp.allclose(out_a, ref_a, atol=1e-4, rtol=1e-4), float(
        jnp.max(jnp.abs(out_a - ref_a))
    )

    # Module-spec spatial size (56x56 -> rows = 3136): two column tiles with a
    # ragged (masked) last tile, exercising the no-pad boundary path.
    x121_b = jax.random.normal(k1, (1, C_MID, 56, 56), dtype=jnp.float32)
    out_b = jax.block_until_ready(se_block(x121_b, x124_a, w1_oi, b1, w2_oi))
    ref_b = _reference(x121_b, x124_a, w1_oi, b1, w2_oi)
    assert out_b.shape == (1, C_OUT, 56, 56), out_b.shape
    assert jnp.allclose(out_b, ref_b, atol=1e-4, rtol=1e-4), float(
        jnp.max(jnp.abs(out_b - ref_b))
    )

    # bf16 activations straight from the producer (no wrapper cast pass):
    # halves HBM traffic on this bandwidth-bound kernel.
    out_c = jax.block_until_ready(
        se_block(
            x121_a.astype(jnp.bfloat16), x124_a.astype(jnp.bfloat16),
            w1_oi, b1, w2_oi,
        )
    )
    assert out_c.dtype == jnp.bfloat16
    assert jnp.allclose(out_c.astype(jnp.float32), ref_a, atol=1.5e-1, rtol=1.5e-1), float(
        jnp.max(jnp.abs(out_c.astype(jnp.float32) - ref_a))
    )

    print("KERNEL_OK")
</pallas_src>

<mosaic_0001>
module attributes {stable_mosaic.version = 11 : i64} {
  func.func @_se_kernel(%arg0: i32, %arg1: memref<1x12xf32, #tpu.memory_space<vmem>>, %arg2: memref<12x288xf32, #tpu.memory_space<vmem>>, %arg3: memref<1x288xf32, #tpu.memory_space<vmem>>, %arg4: memref<48x288xf32, #tpu.memory_space<vmem>>, %arg5: memref<288x128xf32, #tpu.memory_space<vmem>>, %arg6: memref<48x128xf32, #tpu.memory_space<vmem>>) attributes {dimension_semantics = [#tpu.dimension_semantics<parallel>], iteration_bounds = array<i64: 2>, scalar_prefetch = 0 : i64, scratch_operands = 0 : i64, tpu.core_type = #tpu.core_type<tc>, window_params = [{pipeline_mode = #tpu.pipeline_mode<synchronous>, transform_indices = @transform_0, window_bounds = array<i64: 1, 12>}, {pipeline_mode = #tpu.pipeline_mode<synchronous>, transform_indices = @transform_1, window_bounds = array<i64: 12, 288>}, {pipeline_mode = #tpu.pipeline_mode<synchronous>, transform_indices = @transform_2, window_bounds = array<i64: 1, 288>}, {pipeline_mode = #tpu.pipeline_mode<synchronous>, transform_indices = @transform_3, window_bounds = array<i64: 48, 288>}, {transform_indices = @transform_4, window_bounds = array<i64: 288, 128>}, {transform_indices = @transform_5, window_bounds = array<i64: 48, 128>}]} {
    %c0 = arith.constant 0 : index
    %c0_0 = arith.constant 0 : index
    %0 = vector.load %arg1[%c0, %c0_0] : memref<1x12xf32, #tpu.memory_space<vmem>>, vector<1x12xf32>
    %c0_1 = arith.constant 0 : index
    %c0_2 = arith.constant 0 : index
    %1 = vector.load %arg2[%c0_1, %c0_2] : memref<12x288xf32, #tpu.memory_space<vmem>>, vector<12x288xf32>
    %cst = arith.constant dense<0.000000e+00> : vector<1x288xf32>
    %2 = tpu.matmul %0, %1, %cst {dimension_numbers = #tpu.dot_dimension_numbers<[1], [0], [0], [1], [0, 0, 1, 1], [], []>} : vector<1x12xf32>, vector<12x288xf32>, vector<1x288xf32> -> vector<1x288xf32>
    %c0_3 = arith.constant 0 : index
    %c0_4 = arith.constant 0 : index
    %3 = vector.load %arg3[%c0_3, %c0_4] : memref<1x288xf32, #tpu.memory_space<vmem>>, vector<1x288xf32>
    %4 = arith.addf %2, %3 : vector<1x288xf32>
    %5 = arith.negf %4 : vector<1x288xf32>
    %6 = math.exp %5 : vector<1x288xf32>
    %cst_5 = arith.constant 1.000000e+00 : f32
    %7 = vector.broadcast %cst_5 : f32 to vector<1x288xf32>
    %8 = arith.addf %7, %6 : vector<1x288xf32>
    %9 = arith.divf %7, %8 : vector<1x288xf32>
    %c0_6 = arith.constant 0 : index
    %c0_7 = arith.constant 0 : index
    %10 = vector.load %arg4[%c0_6, %c0_7] : memref<48x288xf32, #tpu.memory_space<vmem>>, vector<48x288xf32>
    %11 = vector.broadcast %9 : vector<1x288xf32> to vector<48x288xf32>
    %12 = arith.mulf %10, %11 : vector<48x288xf32>
    %c0_8 = arith.constant 0 : index
    %c0_9 = arith.constant 0 : index
    %13 = vector.load %arg5[%c0_8, %c0_9] : memref<288x128xf32, #tpu.memory_space<vmem>>, vector<288x128xf32>
    %cst_10 = arith.constant dense<0.000000e+00> : vector<48x128xf32>
    %14 = tpu.matmul %12, %13, %cst_10 {dimension_numbers = #tpu.dot_dimension_numbers<[1], [0], [0], [1], [0, 0, 1, 1], [], []>} : vector<48x288xf32>, vector<288x128xf32>, vector<48x128xf32> -> vector<48x128xf32>
    %c0_11 = arith.constant 0 : index
    %c0_12 = arith.constant 0 : index
    %15 = vector.load %arg6[%c0_11, %c0_12] : memref<48x128xf32, #tpu.memory_space<vmem>>, vector<48x128xf32>
    tpu.vector_store %arg6[%c0_11, %c0_12], %14 {strides = array<i32>} : memref<48x128xf32, #tpu.memory_space<vmem>>, vector<48x128xf32>,
    return
  }
  func.func @transform_0(%arg0: i32) -> (i32, i32) {
    %c0_i32 = arith.constant 0 : i32
    %c0_i32_0 = arith.constant 0 : i32
    %c0_i32_1 = arith.constant 0 : i32
    return %c0_i32, %c0_i32_0 : i32, i32
  }
  func.func @transform_1(%arg0: i32) -> (i32, i32) {
    %c0_i32 = arith.constant 0 : i32
    %c0_i32_0 = arith.constant 0 : i32
    %c0_i32_1 = arith.constant 0 : i32
    return %c0_i32, %c0_i32_0 : i32, i32
  }
  func.func @transform_2(%arg0: i32) -> (i32, i32) {
    %c0_i32 = arith.constant 0 : i32
    %c0_i32_0 = arith.constant 0 : i32
    %c0_i32_1 = arith.constant 0 : i32
    return %c0_i32, %c0_i32_0 : i32, i32
  }
  func.func @transform_3(%arg0: i32) -> (i32, i32) {
    %c0_i32 = arith.constant 0 : i32
    %c0_i32_0 = arith.constant 0 : i32
    %c0_i32_1 = arith.constant 0 : i32
    return %c0_i32, %c0_i32_0 : i32, i32
  }
  func.func @transform_4(%arg0: i32) -> (i32, i32) {
    %c0_i32 = arith.constant 0 : i32
    %c0_i32_0 = arith.constant 0 : i32
    return %c0_i32, %arg0 : i32, i32
  }
  func.func @transform_5(%arg0: i32) -> (i32, i32) {
    %c0_i32 = arith.constant 0 : i32
    %c0_i32_0 = arith.constant 0 : i32
    return %c0_i32, %arg0 : i32, i32
  }
}

</mosaic_0001>

<bundles_post_ra>
// kernel: se_block.1
= control target key start
LH: loop header
LB: loop body
LE: loop exit
PB: predicated region body
PF: predicated region fallthrough
CT: control target
= control target key end

     0   :  { %s1267_s18 = smov 0   ;;  %s1269_s19 = smov 0   ;;  %s1543_s0 = inlined_call_operand.vmem [shape: f32[1,12], index: 0, kind: input, shape index: {}]   ;;  %s1544_s1 = inlined_call_operand.vmem [shape: f32[12,288], index: 1, kind: input, shape index: {}]   ;;  %s1545_s2 = inlined_call_operand.vmem [shape: f32[1,288], index: 2, kind: input, shape index: {}]   ;;  %s1546_s3 = inlined_call_operand.vmem [shape: f32[48,288], index: 3, kind: input, shape index: {}]   ;;  %s1547_s4 = inlined_call_operand.vmem [shape: f32[288,256], index: 4, kind: input, shape index: {}]   ;;  %s1548_s5 = inlined_call_operand.vmem [shape: f32[48,256], index: 5, kind: output, shape index: {}]  }
   0x1   :  { %s1271_s20 = smov 0  }
   0x2 LB: > { %s1006_s21 = sadd.s32 4294967295, %s1231_s20   ;;  %s1284_s22 = sadd.s32 1, %s1231_s20   ;;  %s1231_s20 = sphi %s1271_s20, %s1552_s20   ;;  %s1227_s19 = sphi %s1269_s19, %s1551_s19   ;;  %s1223_s18 = sphi %s1267_s18, %s1550_s18  }
   0x3   : > { %s103_s23 = ssub.s32 %s1231_s20, %s1284_s22  ;;  %s106_s24 = sadd.s32 1, %s1227_s19 }
   0x4   : > { %p104_p0 = scmp.eq.s32.totalorder %s103_s23, 0  ;;  %p113_p1 = scmp.ne.s32.totalorder %s1227_s19, %s1223_s18 }
   0x5   : > { %p114_p2 = scmp.eq.s32.totalorder %s1231_s20, 0  ;;  %p143_p3 = scmp.eq.s32.totalorder %s1006_s21, 1 }
   0x6   : > { %s1295_s25 = scalar_select %p104_p0, %s1227_s19, %s106_s24  }
   0x7   : > { %p115_p4 = por %p114_p2, %p113_p1  ;;  %p1297_p5 = por %p143_p3, %p113_p1 }
   0x8   : > { %p1009_p6 = scmp.ge.s32.totalorder %s1231_s20, 2 }
   0xa   : > { %177 = sbr.rel (%p1009_p6) target bundleno = 39 (0x27), region = 32 }
  0x11   : > { %180 = sbr.rel (!%p115_p4) target bundleno = 39 (0x27), region = 36  ;;  %s182_s27 = sand.u32 (%p115_p4), 1, %s1227_s19  }
  0x12   : > { %s1010_s28 = sshll.u32 (%p115_p4), %s1231_s20, 3  ;;  %s1166_s29 = smul.u32 (%p115_p4), 288, %s182_s27 }
  0x13   : > { %s1307_s7 = scalar_lea.vmem (%p115_p4), %s1547_s4, %s1010_s28 }
  0x14   : > { %v284_v0 = vld [vmem:[%s1307_s7] sm:$0xff] (%p115_p4)  ;;  %v286_v1 = vld [vmem:[%s1307_s7 + $0x10] sm:$0xff] (%p115_p4)  ;;  %s1315_s8 = scalar_lea.vmem (%p115_p4), [#allocation2], %s1166_s29 }
  0x15   : > { %v288_v2 = vld [vmem:[%s1307_s7 + $0x20] sm:$0xff] (%p115_p4)  ;;  %v290_v3 = vld [vmem:[%s1307_s7 + $0x30] sm:$0xff] (%p115_p4)  ;;  %285 = vst [vmem:[%s1315_s8] sm:$0xff] (%p115_p4), %v284_v0  ;;  %287 = vst [vmem:[%s1315_s8 + $0x8] sm:$0xff] (%p115_p4), %v286_v1 }
  0x16   : > { %v292_v4 = vld [vmem:[%s1307_s7 + $0x40] sm:$0xff] (%p115_p4)  ;;  %v294_v5 = vld [vmem:[%s1307_s7 + $0x50] sm:$0xff] (%p115_p4)  ;;  %289 = vst [vmem:[%s1315_s8 + $0x10] sm:$0xff] (%p115_p4), %v288_v2  ;;  %291 = vst [vmem:[%s1315_s8 + $0x18] sm:$0xff] (%p115_p4), %v290_v3 }
  0x17   : > { %293 = vst [vmem:[%s1315_s8 + $0x20] sm:$0xff] (%p115_p4), %v292_v4  ;;  %295 = vst [vmem:[%s1315_s8 + $0x28] sm:$0xff] (%p115_p4), %v294_v5  ;;  %v296_v6 = vld [vmem:[%s1307_s7 + $0x60] sm:$0xff] (%p115_p4)  ;;  %v298_v7 = vld [vmem:[%s1307_s7 + $0x70] sm:$0xff] (%p115_p4) }
  0x18   : > { %v300_v8 = vld [vmem:[%s1307_s7 + $0x80] sm:$0xff]  ;;  %297 = vst [vmem:[%s1315_s8 + $0x30] sm:$0xff] %v296_v6  ;;  %299 = vst [vmem:[%s1315_s8 + $0x38] sm:$0xff] %v298_v7  ;;  %v302_v9 = vld [vmem:[%s1307_s7 + $0x90] sm:$0xff] }
  0x19   : > { %301 = vst [vmem:[%s1315_s8 + $0x40] sm:$0xff] %v300_v8  ;;  %v304_v10 = vld [vmem:[%s1307_s7 + $0xa0] sm:$0xff]  ;;  %v306_v11 = vld [vmem:[%s1307_s7 + $0xb0] sm:$0xff]  ;;  %303 = vst [vmem:[%s1315_s8 + $0x48] sm:$0xff] %v302_v9 }
  0x1a   : > { %305 = vst [vmem:[%s1315_s8 + $0x50] sm:$0xff] %v304_v10  ;;  %307 = vst [vmem:[%s1315_s8 + $0x58] sm:$0xff] %v306_v11  ;;  %v308_v12 = vld [vmem:[%s1307_s7 + $0xc0] sm:$0xff]  ;;  %v310_v13 = vld [vmem:[%s1307_s7 + $0xd0] sm:$0xff] }
  0x1b   : > { %v312_v14 = vld [vmem:[%s1307_s7 + $0xe0] sm:$0xff]  ;;  %309 = vst [vmem:[%s1315_s8 + $0x60] sm:$0xff] %v308_v12  ;;  %311 = vst [vmem:[%s1315_s8 + $0x68] sm:$0xff] %v310_v13  ;;  %v314_v15 = vld [vmem:[%s1307_s7 + $0xf0] sm:$0xff] }
  0x1c   : > { %313 = vst [vmem:[%s1315_s8 + $0x70] sm:$0xff] %v312_v14  ;;  %v316_v16 = vld [vmem:[%s1307_s7 + $0x100] sm:$0xff]  ;;  %v318_v17 = vld [vmem:[%s1307_s7 + $0x110] sm:$0xff]  ;;  %315 = vst [vmem:[%s1315_s8 + $0x78] sm:$0xff] %v314_v15 }
  0x1d   : > { %317 = vst [vmem:[%s1315_s8 + $0x80] sm:$0xff] %v316_v16  ;;  %319 = vst [vmem:[%s1315_s8 + $0x88] sm:$0xff] %v318_v17  ;;  %v320_v18 = vld [vmem:[%s1307_s7 + $0x120] sm:$0xff]  ;;  %v322_v19 = vld [vmem:[%s1307_s7 + $0x130] sm:$0xff] }
  0x1e   : > { %v324_v20 = vld [vmem:[%s1307_s7 + $0x140] sm:$0xff]  ;;  %321 = vst [vmem:[%s1315_s8 + $0x90] sm:$0xff] %v320_v18  ;;  %323 = vst [vmem:[%s1315_s8 + $0x98] sm:$0xff] %v322_v19  ;;  %v326_v21 = vld [vmem:[%s1307_s7 + $0x150] sm:$0xff] }
  0x1f   : > { %325 = vst [vmem:[%s1315_s8 + $0xa0] sm:$0xff] %v324_v20  ;;  %v328_v22 = vld [vmem:[%s1307_s7 + $0x160] sm:$0xff]  ;;  %v330_v23 = vld [vmem:[%s1307_s7 + $0x170] sm:$0xff]  ;;  %327 = vst [vmem:[%s1315_s8 + $0xa8] sm:$0xff] %v326_v21 }
  0x20   : > { %329 = vst [vmem:[%s1315_s8 + $0xb0] sm:$0xff] %v328_v22  ;;  %331 = vst [vmem:[%s1315_s8 + $0xb8] sm:$0xff] %v330_v23  ;;  %v332_v24 = vld [vmem:[%s1307_s7 + $0x180] sm:$0xff]  ;;  %v334_v25 = vld [vmem:[%s1307_s7 + $0x190] sm:$0xff] }
  0x21   : > { %v336_v26 = vld [vmem:[%s1307_s7 + $0x1a0] sm:$0xff]  ;;  %333 = vst [vmem:[%s1315_s8 + $0xc0] sm:$0xff] %v332_v24  ;;  %335 = vst [vmem:[%s1315_s8 + $0xc8] sm:$0xff] %v334_v25  ;;  %v338_v27 = vld [vmem:[%s1307_s7 + $0x1b0] sm:$0xff] }
  0x22   : > { %337 = vst [vmem:[%s1315_s8 + $0xd0] sm:$0xff] %v336_v26  ;;  %v340_v28 = vld [vmem:[%s1307_s7 + $0x1c0] sm:$0xff]  ;;  %v342_v29 = vld [vmem:[%s1307_s7 + $0x1d0] sm:$0xff]  ;;  %339 = vst [vmem:[%s1315_s8 + $0xd8] sm:$0xff] %v338_v27 }
  0x23   : > { %341 = vst [vmem:[%s1315_s8 + $0xe0] sm:$0xff] %v340_v28  ;;  %343 = vst [vmem:[%s1315_s8 + $0xe8] sm:$0xff] %v342_v29  ;;  %v344_v30 = vld [vmem:[%s1307_s7 + $0x1e0] sm:$0xff]  ;;  %v346_v31 = vld [vmem:[%s1307_s7 + $0x1f0] sm:$0xff] }
  0x24   : > { %v348_v32 = vld [vmem:[%s1307_s7 + $0x200] sm:$0xff]  ;;  %345 = vst [vmem:[%s1315_s8 + $0xf0] sm:$0xff] %v344_v30  ;;  %347 = vst [vmem:[%s1315_s8 + $0xf8] sm:$0xff] %v346_v31  ;;  %v350_v33 = vld [vmem:[%s1307_s7 + $0x210] sm:$0xff] }
  0x25   : > { %349 = vst [vmem:[%s1315_s8 + $0x100] sm:$0xff] %v348_v32  ;;  %v352_v34 = vld [vmem:[%s1307_s7 + $0x220] sm:$0xff]  ;;  %v354_v35 = vld [vmem:[%s1307_s7 + $0x230] sm:$0xff]  ;;  %351 = vst [vmem:[%s1315_s8 + $0x108] sm:$0xff] %v350_v33 }
  0x26   : > { %353 = vst [vmem:[%s1315_s8 + $0x110] sm:$0xff] %v352_v34  ;;  %355 = vst [vmem:[%s1315_s8 + $0x118] sm:$0xff] %v354_v35 }
  0x27 PF: > { %p1011_p7 = scmp.ge.s32.totalorder %s1231_s20, 1  ;;  %p360_p8 = scmp.lt.s32.totalorder %s1231_s20, 3 }
  0x29   : > { %p361_p9 = pnand %p1011_p7, %p360_p8 }
  0x2a   : > { %v395_v36 = vld [vmem:[%s1544_s1 + $0x8] sm:$0xff] (!%p361_p9)  ;;  %v398_v37 = vld [vmem:[%s1544_s1 + $0x20] sm:$0xf] (!%p361_p9)  ;;  %vm421_vm0 = vcmask (!%p361_p9), 1043456   ;;  %vm1233_vm1 = vmmov (!%p361_p9), 1   ;;  %v1234_v42 = vmov (!%p361_p9), 0.0  }
  0x2b   : > { %364 = sbr.rel (%p361_p9) target bundleno = 541 (0x21d), region = 74  ;;  %v394_v38 = vld [vmem:[%s1544_s1] sm:$0xff] (!%p361_p9)  ;;  %v1116_v39 = vpack.c.bf16 (!%p361_p9), %v398_v37, %v395_v36  ;;  %vm1117_vm2 = vmpackc.low (!%p361_p9), %vm421_vm0, %vm1233_vm1  ;;  %v397_v40 = vld [vmem:[%s1544_s1 + $0x18] sm:$0xf] (!%p361_p9)  ;;  %495 = vmatprep.mubr.f32.mxu1 (!%p361_p9), %v1234_v42  ;;  %vm417_vm3 = vcmask (!%p361_p9), 97280   ;;  %v1235_v47 = vmov (!%p361_p9), 0.0|0.0  }
  0x2c   : > { %v1119_v41 = vpack.c.bf16 (!%p361_p9), %v397_v40, %v394_v38  ;;  %v396_v43 = vld [vmem:[%s1544_s1 + $0x10] sm:$0xff] (!%p361_p9)  ;;  %v399_v44 = vld [vmem:[%s1544_s1 + $0x28] sm:$0xf] (!%p361_p9)  ;;  %v393_v45 = vld [vmem:[%s1543_s0] sm:$0x1] (!%p361_p9)  ;;  %vm1236_vm4 = vmmov (!%p361_p9), 0   ;;  %v402_v38 = vlaneseq (!%p361_p9) }
  0x2d   : > { %1118 = vmatprep.subr.msk.bf16.mxu1 (!%p361_p9), %vm1117_vm2, %v1116_v39  ;;  %v1123_v46 = vpack.c.bf16 (!%p361_p9), %v399_v44, %v396_v43  ;;  %s367_s30 = sand.u32 (!%p361_p9), 1, %s1223_s18   ;;  %vm674_vm5 = vcmask (!%p361_p9), 261120  }
  0x2e   : > { %1121 = vmatpush1.bf16.msk.msra.mxu1 (!%p361_p9), %vm1117_vm2, %v1119_v41  ;;  %s1167_s6 = smul.u32 (!%p361_p9), 288, %s367_s30  ;;  %v403_v39 = vshrl.u32 (!%p361_p9), %v402_v38, 7  ;;  %v400_v41 = vld [vmem:[%s1545_s2] sm:$0x7] (!%p361_p9) }
  0x2f   : > { %1122 = vmatprep.subr.bf16.mxu1 (!%p361_p9), %v1235_v47  ;;  %s1168_s12 = smul.u32 (!%p361_p9), 48, %s367_s30 }
  0x30   : > { %s1409_s7 = scalar_lea.vmem (!%p361_p9), [#allocation2], %s1167_s6  ;;  %v404_v40 = vsub.s32 (!%p361_p9), 0, %v403_v39  ;;  %v412_v44 = vsub.s32 (!%p361_p9), 2, %v403_v39 }
  0x31   : > { %1014 = vmatmul.mubr.msk.f32.vlgmr.msra.gmra.mrb[0].mxu1 (!%p361_p9), %vm417_vm3, %v393_v45  ;;  %v654_v48 = vld [vmem:[%s1409_s7 + $0x80] sm:$0xff] (!%p361_p9)  ;;  %v655_v49 = vld [vmem:[%s1409_s7 + $0x88] sm:$0xff] (!%p361_p9)  ;;  %v656_v54 = vld [vmem:[%s1409_s7 + $0x90] sm:$0xff] (!%p361_p9)  ;;  %s1512_s13 = scalar_lea.vmem (!%p361_p9), [#allocation3], %s1168_s12 }
  0x32   : > { %1125 = vmatpush3.bf16.msk.msra.mxu1 %vm1117_vm2, %v1123_v46  ;;  %1096 = vmatprep.mubr.msk.f32.mxu1 %vm1236_vm4, %v1234_v42  ;;  %v1126_v50 = vpack.c.bf16 %v655_v49, %v654_v48  ;;  %v638_v51 = vld [vmem:[%s1409_s7] sm:$0xff]  ;;  %v639_v52 = vld [vmem:[%s1409_s7 + $0x8] sm:$0xff]  ;;  %v657_v55 = vld [vmem:[%s1409_s7 + $0x98] sm:$0xff]  ;;  %v408_v42 = vsub.s32 1, %v403_v39  ;;  %v405_v43 = vrot.slane %v400_v41, %v404_v40  ;;  %v413_v49 = vrot.slane %v400_v41, %v412_v44  ;;  %s1026_s18 = sshll.u32 (%p1297_p5), %s1006_s21, 3 }
  0x33   : > { %v1128_v53 = vpack.c.bf16 %v639_v52, %v638_v51  ;;  %v1130_v56 = vpack.c.bf16 %v657_v55, %v656_v54  ;;  %v640_v57 = vld [vmem:[%s1409_s7 + $0x10] sm:$0xff]  ;;  %v641_v58 = vld [vmem:[%s1409_s7 + $0x18] sm:$0xff]  ;;  %v658_v60 = vld [vmem:[%s1409_s7 + $0xa0] sm:$0xff]  ;;  %s897_s15 = scalar_lea.vmem (%p1297_p5), %s1548_s5, %s1026_s18 }
  0x34   : > { %1127 = vmatprep.subr.bf16.mxu0 %v1126_v50  ;;  %v1132_v59 = vpack.c.bf16 %v641_v58, %v640_v57  ;;  %v659_v61 = vld [vmem:[%s1409_s7 + $0xa8] sm:$0xff]  ;;  %v642_v63 = vld [vmem:[%s1409_s7 + $0x20] sm:$0xff]  ;;  %v660_v2 = vld [vmem:[%s1409_s7 + $0xb0] sm:$0xff] }
  0x35   : > { %1097 = vmatmul.mubr.msk.f32.vlgmr.msra.gmra.mrb[2].mxu1 %vm417_vm3, %v393_v45  ;;  %1129 = vmatpush3.bf16.msra.mxu0 %v1128_v53  ;;  %v1134_v62 = vpack.c.bf16 %v659_v61, %v658_v60  ;;  %v643_v0 = vld [vmem:[%s1409_s7 + $0x28] sm:$0xff]  ;;  %v661_v3 = vld [vmem:[%s1409_s7 + $0xb8] sm:$0xff]  ;;  %v644_v5 = vld [vmem:[%s1409_s7 + $0x30] sm:$0xff]  ;;  %v409_v45 = vrot.slane %v400_v41, %v408_v42 }
  0x36   : > { %1131 = vmatprep.subr.bf16.mxu0 %v1130_v56  ;;  %v1136_v1 = vpack.c.bf16 %v643_v0, %v642_v63  ;;  %v1138_v4 = vpack.c.bf16 %v661_v3, %v660_v2  ;;  %v645_v6 = vld [vmem:[%s1409_s7 + $0x38] sm:$0xff]  ;;  %v662_v8 = vld [vmem:[%s1409_s7 + $0xc0] sm:$0xff]  ;;  %v663_v9 = vld [vmem:[%s1409_s7 + $0xc8] sm:$0xff] }
  0x37   : > { %v1140_v7 = vpack.c.bf16 %v645_v6, %v644_v5  ;;  %v1142_v10 = vpack.c.bf16 %v663_v9, %v662_v8  ;;  %v646_v11 = vld [vmem:[%s1409_s7 + $0x40] sm:$0xff]  ;;  %v647_v12 = vld [vmem:[%s1409_s7 + $0x48] sm:$0xff]  ;;  %v664_v14 = vld [vmem:[%s1409_s7 + $0xd0] sm:$0xff] }
  0x38   : > { %v1144_v13 = vpack.c.bf16 %v647_v12, %v646_v11  ;;  %v665_v15 = vld [vmem:[%s1409_s7 + $0xd8] sm:$0xff]  ;;  %v648_v17 = vld [vmem:[%s1409_s7 + $0x50] sm:$0xff]  ;;  %v666_v20 = vld [vmem:[%s1409_s7 + $0xe0] sm:$0xff] }
  0x39   : > { %1133 = vmatpush3.bf16.msra.mxu0 %v1132_v59  ;;  %v1146_v16 = vpack.c.bf16 %v665_v15, %v664_v14  ;;  %v649_v18 = vld [vmem:[%s1409_s7 + $0x58] sm:$0xff]  ;;  %v667_v21 = vld [vmem:[%s1409_s7 + $0xe8] sm:$0xff]  ;;  %v650_v23 = vld [vmem:[%s1409_s7 + $0x60] sm:$0xff] }
  0x3a   : > { %1135 = vmatprep.subr.bf16.mxu0 %v1134_v62  ;;  %v1148_v19 = vpack.c.bf16 %v649_v18, %v648_v17  ;;  %v1150_v22 = vpack.c.bf16 %v667_v21, %v666_v20  ;;  %v651_v24 = vld [vmem:[%s1409_s7 + $0x68] sm:$0xff]  ;;  %v670_v26 = vld [vmem:[%s1409_s7 + $0x100] sm:$0xff]  ;;  %v668_v29 = vld [vmem:[%s1409_s7 + $0xf0] sm:$0xff] }
  0x3b   : > { %v1152_v25 = vpack.c.bf16 %v651_v24, %v650_v23  ;;  %v671_v27 = vld [vmem:[%s1409_s7 + $0x108] sm:$0xff]  ;;  %v669_v30 = vld [vmem:[%s1409_s7 + $0xf8] sm:$0xff]  ;;  %v652_v32 = vld [vmem:[%s1409_s7 + $0x70] sm:$0xff] }
  0x3c   : > { %v1158_v28 = vpack.c.bf16 %v671_v27, %v670_v26  ;;  %v1154_v31 = vpack.c.bf16 %v669_v30, %v668_v29  ;;  %v653_v33 = vld [vmem:[%s1409_s7 + $0x78] sm:$0xff]  ;;  %v672_v35 = vld [vmem:[%s1409_s7 + $0x110] sm:$0xff]  ;;  %v591_v2 = vld [vmem:[%s1546_s3 + $0x8] sm:$0xff] }
  0x3d   : > { %1137 = vmatpush3.bf16.msra.mxu0 %v1136_v1  ;;  %v1156_v34 = vpack.c.bf16 %v653_v33, %v652_v32  ;;  %v673_v36 = vld [vmem:[%s1409_s7 + $0x118] sm:$0xff]  ;;  %v594_v5 = vld [vmem:[%s1546_s3 + $0x20] sm:$0xff]  ;;  %v592_v8 = vld [vmem:[%s1546_s3 + $0x10] sm:$0xff] }
  0x3e   : > { %1139 = vmatprep.subr.bf16.mxu0 %v1138_v4  ;;  %1159 = vmatprep.subr.bf16.mxu1 %v1158_v28  ;;  %v1162_v37 = vpack.c.bf16 %v673_v36, %v672_v35  ;;  %v590_v4 = vld [vmem:[%s1546_s3] sm:$0xff]  ;;  %v595_v9 = vld [vmem:[%s1546_s3 + $0x28] sm:$0xff]  ;;  %v593_v14 = vld [vmem:[%s1546_s3 + $0x18] sm:$0xff] }
  0x3f   : > { %1161 = vmatpush3.bf16.msra.mxu1 %v1158_v28  ;;  %v597_v17 = vld [vmem:[%s1546_s3 + $0x38] sm:$0xff]  ;;  %v604_v20 = vld [vmem:[%s1546_s3 + $0x70] sm:$0xff]  ;;  %v607_v27 = vld [vmem:[%s1546_s3 + $0x88] sm:$0xff] }
  0x40   : > { %1163 = vmatprep.subr.bf16.mxu1 %v1162_v37  ;;  %v596_v23 = vld [vmem:[%s1546_s3 + $0x30] sm:$0xff]  ;;  %v599_v30 = vld [vmem:[%s1546_s3 + $0x48] sm:$0xff]  ;;  %v602_v35 = vld [vmem:[%s1546_s3 + $0x60] sm:$0xff] }
  0x41   : > { %1141 = vmatpush3.bf16.msra.mxu0 %v1140_v7  ;;  %v603_v32 = vld [vmem:[%s1546_s3 + $0x68] sm:$0xff]  ;;  %v606_v36 = vld [vmem:[%s1546_s3 + $0x80] sm:$0xff]  ;;  %v605_v39 = vld [vmem:[%s1546_s3 + $0x78] sm:$0xff] }
  0x42   : > { %1143 = vmatprep.subr.bf16.mxu0 %v1142_v10  ;;  %v598_v10 = vld [vmem:[%s1546_s3 + $0x40] sm:$0xff] }
  0x43   : > { %1165 = vmatpush3.bf16.msra.mxu1 %v1162_v37 }
  0x45   : > { %1145 = vmatpush3.bf16.msra.mxu0 %v1144_v13 }
  0x46   : > { %1147 = vmatprep.subr.bf16.mxu0 %v1146_v16 }
  0x49   : > { %1149 = vmatpush3.bf16.msra.mxu0 %v1148_v19  ;;  %v601_v19 = vld [vmem:[%s1546_s3 + $0x58] sm:$0xff] }
  0x4a   : > { %1151 = vmatprep.subr.bf16.mxu0 %v1150_v22 }
  0x4d   : > { %1153 = vmatpush3.bf16.msra.mxu0 %v1152_v25  ;;  %v600_v25 = vld [vmem:[%s1546_s3 + $0x50] sm:$0xff] }
  0x4e   : > { %1155 = vmatprep.subr.bf16.mxu0 %v1154_v31 }
  0x51   : > { %1157 = vmatpush3.bf16.msra.mxu0 %v1156_v34 }
 0x104   : > { %v497_v46 = vpop.f32.mrb[0].mxu1 }
 0x105   : > { %v498_v47 = vadd.f32 %v497_v46, %v405_v43  ;;  %v499_v48 = vpop.f32.mrb[1].mxu1 }
 0x106   : > { %v500_v50 = vadd.f32 %v499_v48, %v409_v45 }
 0x107   : > { %v1017_v51 = vmul.f32 -1.442695, %v498_v47 }
 0x108   : > { %v1018_v52 = vmul.f32 -1.442695, %v500_v50  ;;  %v568_v53 = vpop.f32.mrb[2].mxu1 }
 0x109   : > { %1197 = vpow2.f32 %v1017_v51  ;;  %v569_v54 = vadd.f32 %v568_v53, %v413_v49  ;;  %v1098_v55 = vpop.f32.mrb[3].mxu1 }
 0x10a   : > { %1199 = vpow2.f32 %v1018_v52 }
 0x10b   : > { %v1019_v56 = vmul.f32 -1.442695, %v569_v54 }
 0x10d   : > { %1201 = vpow2.f32 %v1019_v56 }
 0x113   : > { %v1198_v57 = vpop.eup %1197 }
 0x114   : > { %v1200_v58 = vpop.eup %1199  ;;  %v581_v59 = vadd.f32 1.0, %v1198_v57 }
 0x115   : > { %v582_v60 = vadd.f32 1.0, %v1200_v58 }
 0x116   : > { %1203 = vrcp.f32 %v581_v59 }
 0x117   : > { %v1202_v61 = vpop.eup %1201  ;;  %1205 = vrcp.f32 %v582_v60 }
 0x118   : > { %v583_v62 = vadd.f32 1.0, %v1202_v61 }
 0x11a   : > { %1207 = vrcp.f32 %v583_v62 }
 0x120   : > { %v1204_v63 = vpop.eup %1203 }
 0x121   : > { %v1206_v0 = vpop.eup %1205  ;;  %v611_v1 = vrot.slane %v1204_v63, %v404_v40 }
 0x122   : > { %v615_v3 = vrot.slane %v1206_v0, %v404_v40 }
 0x123   : > { %v620_v12 = vmul.f32 %v611_v1, %v590_v4  ;;  %v623_v21 = vmul.f32 %v611_v1, %v593_v14  ;;  %v626_v28 = vmul.f32 %v611_v1, %v596_v23  ;;  %v629_v33 = vmul.f32 %v611_v1, %v599_v30 }
 0x124   : > { %v1208_v6 = vpop.eup %1207  ;;  %v621_v7 = vmul.f32 %v615_v3, %v591_v2  ;;  %v624_v13 = vmul.f32 %v615_v3, %v594_v5  ;;  %v627_v22 = vmul.f32 %v615_v3, %v597_v17  ;;  %v630_v29 = vmul.f32 %v615_v3, %v600_v25 }
 0x125   : > { %v619_v11 = vrot.slane %v1208_v6, %v404_v40  ;;  %v633_v34 = vmul.f32 %v615_v3, %v603_v32  ;;  %v632_v37 = vmul.f32 %v611_v1, %v602_v35  ;;  %v636_v38 = vmul.f32 %v615_v3, %v606_v36 }
 0x126   : > { %757 = vmatprep.mubr.f32.mxu0 %v621_v7  ;;  %v635_v40 = vmul.f32 %v611_v1, %v605_v39 }
 0x127   : > { %758 = vmatmul.mubr.f32.vlgmr.msra.gmra.mrb[0].mxu0 %v620_v12  ;;  %v622_v15 = vmul.f32 %v619_v11, %v592_v8  ;;  %v625_v16 = vmul.f32 %v619_v11, %v595_v9  ;;  %v628_v18 = vmul.f32 %v619_v11, %v598_v10  ;;  %v631_v24 = vmul.f32 %v619_v11, %v601_v19 }
 0x128   : > { %762 = vmatprep.mubr.f32.mxu0 %v624_v13  ;;  %v634_v26 = vmul.f32 %v619_v11, %v604_v20  ;;  %v637_v31 = vmul.f32 %v619_v11, %v607_v27 }
 0x129   : > { %1107 = vmatprep.mubr.msk.f32.mxu1 %vm674_vm5, %v622_v15 }
 0x12a   : > { %1108 = vmatmul.mubr.msk.f32.vlgmr.msra.gmra.mrb[4].mxu1 %vm674_vm5, %v625_v16 }
 0x12b   : > { %763 = vmatmul.mubr.f32.gmra.mrb[2].mxu0 %v623_v21  ;;  %1110 = vmatprep.mubr.msk.f32.mxu1 %vm674_vm5, %v628_v18 }
 0x12c   : > { %767 = vmatprep.mubr.f32.mxu0 %v627_v22 }
 0x12e   : > { %1111 = vmatmul.mubr.msk.f32.gmra.mrb[6].mxu1 %vm674_vm5, %v631_v24 }
 0x12f   : > { %768 = vmatmul.mubr.f32.gmra.mrb[4].mxu0 %v626_v28  ;;  %1113 = vmatprep.mubr.msk.f32.mxu1 %vm674_vm5, %v634_v26 }
 0x130   : > { %772 = vmatprep.mubr.f32.mxu0 %v630_v29 }
 0x132   : > { %1114 = vmatmul.mubr.msk.f32.gmra.mrb[8].mxu1 %vm674_vm5, %v637_v31 }
 0x133   : > { %773 = vmatmul.mubr.f32.gmra.mrb[6].mxu0 %v629_v33 }
 0x134   : > { %777 = vmatprep.mubr.f32.mxu0 %v633_v34 }
 0x137   : > { %778 = vmatmul.mubr.f32.gmra.mrb[8].mxu0 %v632_v37 }
 0x138   : > { %782 = vmatprep.mubr.f32.mxu0 %v636_v38 }
 0x13b   : > { %783 = vmatmul.mubr.f32.gmra.mrb[10].mxu0 %v635_v40 }
 0x1fa   : > { %v1064_v41 = vpop.f32.mrb[0].mxu0 }
 0x1fb   : > { %v1065_v42 = vpop.f32.mrb[1].mxu0 }
 0x1fc   : > { %v1066_v43 = vadd.f32 %v1065_v42, %v1064_v41 }
 0x1fd   : > { %v1109_v44 = vpop.f32.mrb[4].mxu1 }
 0x1fe   : > { %v1067_v45 = vpop.f32.mrb[2].mxu0  ;;  %v854_v46 = vpop.f32.mrb[5].mxu1 }
 0x1ff   : > { %v855_v47 = vadd.f32 %v1066_v43, %v854_v46  ;;  %v1068_v48 = vpop.f32.mrb[3].mxu0 }
 0x200   : > { %v1069_v49 = vadd.f32 %v1068_v48, %v1067_v45 }
 0x201   : > { %883 = vst [vmem:[%s1512_s13] sm:$0xff] %v855_v47  ;;  %v1112_v50 = vpop.f32.mrb[6].mxu1 }
 0x202   : > { %v860_v51 = vadd.f32 %v1109_v44, %v1069_v49  ;;  %v1070_v52 = vpop.f32.mrb[4].mxu0  ;;  %v864_v53 = vpop.f32.mrb[7].mxu1 }
 0x203   : > { %v1071_v54 = vpop.f32.mrb[5].mxu0 }
 0x204   : > { %884 = vst [vmem:[%s1512_s13 + $0x8] sm:$0xff] %v860_v51  ;;  %v1072_v55 = vadd.f32 %v1071_v54, %v1070_v52 }
 0x205   : > { %v1115_v56 = vpop.f32.mrb[8].mxu1 }
 0x206   : > { %v865_v57 = vadd.f32 %v1072_v55, %v864_v53  ;;  %v1073_v58 = vpop.f32.mrb[6].mxu0  ;;  %v874_v59 = vpop.f32.mrb[9].mxu1 }
 0x207   : > { %v1074_v60 = vpop.f32.mrb[7].mxu0 }
 0x208   : > { %885 = vst [vmem:[%s1512_s13 + $0x10] sm:$0xff] %v865_v57  ;;  %v1075_v61 = vadd.f32 %v1074_v60, %v1073_v58  ;;  %v935_v7 = vld [vmem:[%s1512_s13] sm:$0xff] (%p1297_p5) }
 0x209   : > { %936 = vst [vmem:[%s897_s15] sm:$0xff] (%p1297_p5), %v935_v7 }
 0x20a   : > { %v870_v62 = vadd.f32 %v1112_v50, %v1075_v61  ;;  %v1076_v63 = vpop.f32.mrb[8].mxu0 }
 0x20b   : > { %v1077_v0 = vpop.f32.mrb[9].mxu0  ;;  %v937_v8 = vld [vmem:[%s1512_s13 + $0x8] sm:$0xff] (%p1297_p5) }
 0x20c   : > { %886 = vst [vmem:[%s1512_s13 + $0x18] sm:$0xff] %v870_v62  ;;  %v1078_v1 = vadd.f32 %v1077_v0, %v1076_v63  ;;  %938 = vst [vmem:[%s897_s15 + $0x10] sm:$0xff] (%p1297_p5), %v937_v8 }
 0x20e   : > { %v875_v2 = vadd.f32 %v1078_v1, %v874_v59  ;;  %v1079_v3 = vpop.f32.mrb[10].mxu0  ;;  %895 = sbr.rel (!%p1297_p5) target bundleno = 541 (0x21d), region = 82 }
 0x20f   : > { %v1080_v4 = vpop.f32.mrb[11].mxu0  ;;  %v939_v9 = vld [vmem:[%s1512_s13 + $0x10] sm:$0xff] (%p1297_p5) }
 0x210   : > { %887 = vst [vmem:[%s1512_s13 + $0x20] sm:$0xff] %v875_v2  ;;  %v1081_v5 = vadd.f32 %v1080_v4, %v1079_v3  ;;  %940 = vst [vmem:[%s897_s15 + $0x20] sm:$0xff] (%p1297_p5), %v939_v9 }
 0x212   : > { %v880_v6 = vadd.f32 %v1115_v56, %v1081_v5 }
 0x213   : > { %v941_v10 = vld [vmem:[%s1512_s13 + $0x18] sm:$0xff] (%p1297_p5) }
 0x214   : > { %888 = vst [vmem:[%s1512_s13 + $0x28] sm:$0xff] %v880_v6  ;;  %942 = vst [vmem:[%s897_s15 + $0x30] sm:$0xff] (%p1297_p5), %v941_v10 }
 0x217   : > { %v943_v11 = vld [vmem:[%s1512_s13 + $0x20] sm:$0xff] }
 0x218   : > { %944 = vst [vmem:[%s897_s15 + $0x40] sm:$0xff] %v943_v11 }
 0x21b   : > { %v945_v12 = vld [vmem:[%s1512_s13 + $0x28] sm:$0xff] }
 0x21c   : > { %946 = vst [vmem:[%s897_s15 + $0x50] sm:$0xff] %v945_v12 }
 0x21d PF: > { %p12_p10 = scmp.ge.s32.totalorder %s1284_s22, 4   ;;  %s1550_s18 = smov %s1227_s19 }
 0x21e   : > { %s1551_s19 = smov %s1295_s25  ;;  %s1552_s20 = smov %s1284_s22 }
 0x21f   :  { %14 = sbr.rel (!%p12_p10) target bundleno = 2 (0x2), region = 151 }

</bundles_post_ra>
